<compile_context>
chip_gen: v6e
topology: v6e:2x2x1
jax: 0.10.0
libtpu: 0.0.40
codegen_flags: <defaults>
</compile_context>

<pallas_src>
import jax
import jax.numpy as jnp
from jax.experimental import pallas as pl
from jax.experimental.pallas import tpu as pltpu


def ddpg_actor_kernel(x_ref,
                      w1_ref, b1_ref,
                      w2_ref, b2_ref,
                      w3_ref, b3_ref,
                      out_ref):
    # x: [state_dim, TILE_B]   (batch on lanes)
    x = x_ref[...]
    # fc1 + relu: [64, S] @ [S, TB] -> [64, TB]
    h1 = jnp.dot(w1_ref[...], x, preferred_element_type=jnp.float32) + b1_ref[...]
    h1 = jnp.maximum(h1, 0.0)
    # fc2 + relu: [32, 64] @ [64, TB] -> [32, TB]
    h2 = jnp.dot(w2_ref[...], h1, preferred_element_type=jnp.float32) + b2_ref[...]
    h2 = jnp.maximum(h2, 0.0)
    # fc3 + tanh: [A, 32] @ [32, TB] -> [A, TB]  (lane-dense output)
    a = jnp.dot(w3_ref[...], h2, preferred_element_type=jnp.float32) + b3_ref[...]
    out_ref[...] = jnp.tanh(a).astype(out_ref.dtype)


def _round_up(x, m):
    return ((x + m - 1) // m) * m


def ddpg_actor_forward(state, params, *, tile_b=512):
    """state: [batch, state_dim] float32 -> [batch, action_dim] float32."""
    w1, b1 = params["w1"], params["b1"]
    w2, b2 = params["w2"], params["b2"]
    w3, b3 = params["w3"], params["b3"]

    batch, state_dim = state.shape
    action_dim = w3.shape[0]

    # Batch tile: multiple of 128 lanes, capped at tile_b; pad batch to fit.
    tb = min(tile_b, _round_up(batch, 128))
    padded = _round_up(batch, tb)

    # Batch-on-lanes: [state_dim, padded_batch]
    x = state.T
    if padded != batch:
        x = jnp.pad(x, ((0, 0), (0, padded - batch)))

    # Weights/biases: full resident blocks (tiny), same tile for every step.
    def resident(a):
        return pl.BlockSpec(a.shape, lambda i: (0,) * a.ndim)

    out_t = pl.pallas_call(
        ddpg_actor_kernel,
        out_shape=jax.ShapeDtypeStruct((action_dim, padded), jnp.float32),
        grid_spec=pl.GridSpec(
            grid=(padded // tb,),
            in_specs=[
                pl.BlockSpec((state_dim, tb), lambda i: (0, i)),   # streamed state
                resident(w1), resident(b1),
                resident(w2), resident(b2),
                resident(w3), resident(b3),
            ],
            out_specs=pl.BlockSpec((action_dim, tb), lambda i: (0, i)),
        ),
        compiler_params=pltpu.CompilerParams(
            dimension_semantics=("parallel",),   # shard batch tiles across TCs (v7x)
        ),
    )(x, w1, b1, w2, b2, w3, b3)

    # Back to the PyTorch-facing layout, dropping batch padding.
    return out_t[:, :batch].T


def init_params(key, state_dim, action_dim):
    """Deterministic init mimicking nn.Linear's U(-1/sqrt(fan_in), 1/sqrt(fan_in)).

    Weights stored feature-major: W is [out, in], b is [out, 1].
    """
    def linear(key, fan_in, fan_out):
        kw, kb = jax.random.split(key)
        bound = 1.0 / jnp.sqrt(fan_in)
        w = jax.random.uniform(kw, (fan_out, fan_in), jnp.float32, -bound, bound)
        b = jax.random.uniform(kb, (fan_out, 1), jnp.float32, -bound, bound)
        return w, b

    k1, k2, k3 = jax.random.split(key, 3)
    w1, b1 = linear(k1, state_dim, 64)
    w2, b2 = linear(k2, 64, 32)
    w3, b3 = linear(k3, 32, action_dim)
    return {"w1": w1, "b1": b1, "w2": w2, "b2": b2, "w3": w3, "b3": b3}


def reference_forward(state, p):
    """Pure-JAX reference in the PyTorch ([batch, features]) layout."""
    h1 = jnp.maximum(state @ p["w1"].T + p["b1"].T, 0.0)
    h2 = jnp.maximum(h1 @ p["w2"].T + p["b2"].T, 0.0)
    return jnp.tanh(h2 @ p["w3"].T + p["b3"].T)


if __name__ == "__main__":
    key = jax.random.PRNGKey(0)
    k_params, k_state, k_state2 = jax.random.split(key, 3)

    state_dim = 4     # e.g. number of columns in the trading dataframe
    action_dim = 1

    params = init_params(k_params, state_dim, action_dim)

    # Small batch (single 128-lane tile after padding).
    batch = 8
    state = jax.random.normal(k_state, (batch, state_dim), jnp.float32)
    out = jax.block_until_ready(ddpg_actor_forward(state, params))
    ref = reference_forward(state, params)
    assert out.shape == (batch, action_dim)
    assert jnp.allclose(out, ref, atol=1e-5, rtol=1e-5)

    # Slightly larger batch to exercise the multi-tile grid + padding path.
    batch2 = 640   # -> TILE_B=512, padded to 1024, grid=(2,)
    state2 = jax.random.normal(k_state2, (batch2, state_dim), jnp.float32)
    out2 = jax.block_until_ready(ddpg_actor_forward(state2, params))
    ref2 = reference_forward(state2, params)
    assert out2.shape == (batch2, action_dim)
    assert jnp.allclose(out2, ref2, atol=1e-5, rtol=1e-5)

    print("KERNEL_OK")
</pallas_src>

<mosaic_0001>
module attributes {stable_mosaic.version = 11 : i64} {
  func.func @ddpg_actor_kernel(%arg0: i32, %arg1: memref<4x128xf32, #tpu.memory_space<vmem>>, %arg2: memref<64x4xf32, #tpu.memory_space<vmem>>, %arg3: memref<64x1xf32, #tpu.memory_space<vmem>>, %arg4: memref<32x64xf32, #tpu.memory_space<vmem>>, %arg5: memref<32x1xf32, #tpu.memory_space<vmem>>, %arg6: memref<1x32xf32, #tpu.memory_space<vmem>>, %arg7: memref<1x1xf32, #tpu.memory_space<vmem>>, %arg8: memref<1x128xf32, #tpu.memory_space<vmem>>) attributes {dimension_semantics = [#tpu.dimension_semantics<parallel>], iteration_bounds = array<i64: 1>, scalar_prefetch = 0 : i64, scratch_operands = 0 : i64, tpu.core_type = #tpu.core_type<tc>, window_params = [{transform_indices = @transform_0, window_bounds = array<i64: 4, 128>}, {pipeline_mode = #tpu.pipeline_mode<synchronous>, transform_indices = @transform_1, window_bounds = array<i64: 64, 4>}, {pipeline_mode = #tpu.pipeline_mode<synchronous>, transform_indices = @transform_2, window_bounds = array<i64: 64, 1>}, {pipeline_mode = #tpu.pipeline_mode<synchronous>, transform_indices = @transform_3, window_bounds = array<i64: 32, 64>}, {pipeline_mode = #tpu.pipeline_mode<synchronous>, transform_indices = @transform_4, window_bounds = array<i64: 32, 1>}, {pipeline_mode = #tpu.pipeline_mode<synchronous>, transform_indices = @transform_5, window_bounds = array<i64: 1, 32>}, {pipeline_mode = #tpu.pipeline_mode<synchronous>, transform_indices = @transform_6, window_bounds = array<i64: 1, 1>}, {transform_indices = @transform_7, window_bounds = array<i64: 1, 128>}]} {
    %c0 = arith.constant 0 : index
    %c0_0 = arith.constant 0 : index
    %0 = vector.load %arg1[%c0, %c0_0] : memref<4x128xf32, #tpu.memory_space<vmem>>, vector<4x128xf32>
    %c0_1 = arith.constant 0 : index
    %c0_2 = arith.constant 0 : index
    %1 = vector.load %arg2[%c0_1, %c0_2] : memref<64x4xf32, #tpu.memory_space<vmem>>, vector<64x4xf32>
    %cst = arith.constant dense<0.000000e+00> : vector<64x128xf32>
    %2 = tpu.matmul %1, %0, %cst {dimension_numbers = #tpu.dot_dimension_numbers<[1], [0], [0], [1], [0, 0, 1, 1], [], []>} : vector<64x4xf32>, vector<4x128xf32>, vector<64x128xf32> -> vector<64x128xf32>
    %c0_3 = arith.constant 0 : index
    %c0_4 = arith.constant 0 : index
    %3 = vector.load %arg3[%c0_3, %c0_4] : memref<64x1xf32, #tpu.memory_space<vmem>>, vector<64x1xf32>
    %4 = vector.broadcast %3 : vector<64x1xf32> to vector<64x128xf32>
    %5 = arith.addf %2, %4 : vector<64x128xf32>
    %cst_5 = arith.constant 0.000000e+00 : f32
    %6 = vector.broadcast %cst_5 : f32 to vector<64x128xf32>
    %7 = arith.maximumf %5, %6 : vector<64x128xf32>
    %c0_6 = arith.constant 0 : index
    %c0_7 = arith.constant 0 : index
    %8 = vector.load %arg4[%c0_6, %c0_7] : memref<32x64xf32, #tpu.memory_space<vmem>>, vector<32x64xf32>
    %cst_8 = arith.constant dense<0.000000e+00> : vector<32x128xf32>
    %9 = tpu.matmul %8, %7, %cst_8 {dimension_numbers = #tpu.dot_dimension_numbers<[1], [0], [0], [1], [0, 0, 1, 1], [], []>} : vector<32x64xf32>, vector<64x128xf32>, vector<32x128xf32> -> vector<32x128xf32>
    %c0_9 = arith.constant 0 : index
    %c0_10 = arith.constant 0 : index
    %10 = vector.load %arg5[%c0_9, %c0_10] : memref<32x1xf32, #tpu.memory_space<vmem>>, vector<32x1xf32>
    %11 = vector.broadcast %10 : vector<32x1xf32> to vector<32x128xf32>
    %12 = arith.addf %9, %11 : vector<32x128xf32>
    %cst_11 = arith.constant 0.000000e+00 : f32
    %13 = vector.broadcast %cst_11 : f32 to vector<32x128xf32>
    %14 = arith.maximumf %12, %13 : vector<32x128xf32>
    %c0_12 = arith.constant 0 : index
    %c0_13 = arith.constant 0 : index
    %15 = vector.load %arg6[%c0_12, %c0_13] : memref<1x32xf32, #tpu.memory_space<vmem>>, vector<1x32xf32>
    %cst_14 = arith.constant dense<0.000000e+00> : vector<1x128xf32>
    %16 = tpu.matmul %15, %14, %cst_14 {dimension_numbers = #tpu.dot_dimension_numbers<[1], [0], [0], [1], [0, 0, 1, 1], [], []>} : vector<1x32xf32>, vector<32x128xf32>, vector<1x128xf32> -> vector<1x128xf32>
    %c0_15 = arith.constant 0 : index
    %c0_16 = arith.constant 0 : index
    %17 = vector.load %arg7[%c0_15, %c0_16] : memref<1x1xf32, #tpu.memory_space<vmem>>, vector<1x1xf32>
    %18 = vector.broadcast %17 : vector<1x1xf32> to vector<1x128xf32>
    %19 = arith.addf %16, %18 : vector<1x128xf32>
    %20 = math.tanh %19 : vector<1x128xf32>
    %c0_17 = arith.constant 0 : index
    %c0_18 = arith.constant 0 : index
    %21 = vector.load %arg8[%c0_17, %c0_18] : memref<1x128xf32, #tpu.memory_space<vmem>>, vector<1x128xf32>
    tpu.vector_store %arg8[%c0_17, %c0_18], %20 {strides = array<i32>} : memref<1x128xf32, #tpu.memory_space<vmem>>, vector<1x128xf32>,
    return
  }
  func.func @transform_0(%arg0: i32) -> (i32, i32) {
    %c0_i32 = arith.constant 0 : i32
    %c0_i32_0 = arith.constant 0 : i32
    return %c0_i32, %arg0 : i32, i32
  }
  func.func @transform_1(%arg0: i32) -> (i32, i32) {
    %c0_i32 = arith.constant 0 : i32
    %c0_i32_0 = arith.constant 0 : i32
    %c0_i32_1 = arith.constant 0 : i32
    return %c0_i32, %c0_i32_0 : i32, i32
  }
  func.func @transform_2(%arg0: i32) -> (i32, i32) {
    %c0_i32 = arith.constant 0 : i32
    %c0_i32_0 = arith.constant 0 : i32
    %c0_i32_1 = arith.constant 0 : i32
    return %c0_i32, %c0_i32_0 : i32, i32
  }
  func.func @transform_3(%arg0: i32) -> (i32, i32) {
    %c0_i32 = arith.constant 0 : i32
    %c0_i32_0 = arith.constant 0 : i32
    %c0_i32_1 = arith.constant 0 : i32
    return %c0_i32, %c0_i32_0 : i32, i32
  }
  func.func @transform_4(%arg0: i32) -> (i32, i32) {
    %c0_i32 = arith.constant 0 : i32
    %c0_i32_0 = arith.constant 0 : i32
    %c0_i32_1 = arith.constant 0 : i32
    return %c0_i32, %c0_i32_0 : i32, i32
  }
  func.func @transform_5(%arg0: i32) -> (i32, i32) {
    %c0_i32 = arith.constant 0 : i32
    %c0_i32_0 = arith.constant 0 : i32
    %c0_i32_1 = arith.constant 0 : i32
    return %c0_i32, %c0_i32_0 : i32, i32
  }
  func.func @transform_6(%arg0: i32) -> (i32, i32) {
    %c0_i32 = arith.constant 0 : i32
    %c0_i32_0 = arith.constant 0 : i32
    %c0_i32_1 = arith.constant 0 : i32
    return %c0_i32, %c0_i32_0 : i32, i32
  }
  func.func @transform_7(%arg0: i32) -> (i32, i32) {
    %c0_i32 = arith.constant 0 : i32
    %c0_i32_0 = arith.constant 0 : i32
    return %c0_i32, %arg0 : i32, i32
  }
}

</mosaic_0001>

<bundles_post_ra>
// kernel: tpu_custom_call.1
= control target key start
LH: loop header
LB: loop body
LE: loop exit
PB: predicated region body
PF: predicated region fallthrough
CT: control target
= control target key end

     0   :  { %s716_s0 = inlined_call_operand.vmem [shape: f32[4,128], index: 0, kind: input, shape index: {}]   ;;  %s717_s1 = inlined_call_operand.vmem [shape: f32[64,4], index: 1, kind: input, shape index: {}]   ;;  %s718_s2 = inlined_call_operand.vmem [shape: f32[64,1], index: 2, kind: input, shape index: {}]   ;;  %s719_s3 = inlined_call_operand.vmem [shape: f32[32,64], index: 3, kind: input, shape index: {}]   ;;  %s720_s4 = inlined_call_operand.vmem [shape: f32[32,1], index: 4, kind: input, shape index: {}]   ;;  %s721_s5 = inlined_call_operand.vmem [shape: f32[1,32], index: 5, kind: input, shape index: {}]   ;;  %s722_s6 = inlined_call_operand.<no memory space> [shape: f32[1,1], index: 6, kind: input, shape index: {}]   ;;  %s723_s7 = inlined_call_operand.hbm [shape: f32[1,128], index: 7, kind: output, shape index: {}]  }
   0x1   :  { %v12_v0 = vstv %s722_s6 }
   0x2   :  { %13 = vst [vmem:[#allocation2] sm:$0x1] %v12_v0 }
   0x3   :  { %v29_v1 = vld [vmem:[%s716_s0] sm:$0xf]  ;;  %vm111_vm0 = vcmask 1043456   ;;  %vm86_vm1 = vcmask 31744   ;;  %v31_v3 = vld [vmem:[%s717_s1 + $0x8] sm:$0xff]  ;;  %v32_v4 = vld [vmem:[%s717_s1 + $0x10] sm:$0xff] }
   0x4   :  { %v30_v2 = vld [vmem:[%s717_s1] sm:$0xff]  ;;  %499 = vmatprep.subr.msk.mxu0 %vm111_vm0, %v29_v1  ;;  %v576_v5 = vmov 0   ;;  %v45_v6 = vld [vmem:[%s718_s2 + $0x38] sm:$0xff]  ;;  %v43_v7 = vld [vmem:[%s718_s2 + $0x28] sm:$0xff] }
   0x5   :  { %501 = vmatprep.mubr.msk.f32.mxu0 %vm86_vm1, %v30_v2  ;;  %500 = vmatpush3.msk.msra.mxu0 %vm111_vm0, %v29_v1  ;;  %v33_v8 = vld [vmem:[%s717_s1 + $0x18] sm:$0xff]  ;;  %v34_v9 = vld [vmem:[%s717_s1 + $0x20] sm:$0xff]  ;;  %v44_v10 = vld [vmem:[%s718_s2 + $0x30] sm:$0xff] }
   0x6   :  { %550 = vset.pattern.permute.xlu0 %v576_v5  ;;  %502 = vmatmul.mubr.msk.f32.vlgmr.msra.gmra.mxu0 %vm86_vm1, %v31_v3  ;;  %v42_v11 = vld [vmem:[%s718_s2 + $0x20] sm:$0xff] }
   0x7   :  { %551 = vset.pattern.permute.xlu1 %v576_v5  ;;  %504 = vmatprep.mubr.msk.f32.mxu0 %vm86_vm1, %v32_v4 }
   0x8   :  { %83 = vperm.xlu0 %550, %v45_v6   ;;  %73 = vperm.xlu1 %551, %v43_v7  }
   0xa   :  { %505 = vmatmul.mubr.msk.f32.gmra.mxu0 %vm86_vm1, %v33_v8 }
   0xb   :  { %14 = vsyncpa [#allocation4], 0  ;;  %507 = vmatprep.mubr.msk.f32.mxu0 %vm86_vm1, %v34_v9  ;;  %v35_v12 = vld [vmem:[%s717_s1 + $0x28] sm:$0xff]  ;;  %v36_v13 = vld [vmem:[%s717_s1 + $0x30] sm:$0xff]  ;;  %vm256_vm2 = vcmask 523264   ;;  %v577_v60 = vmov 0.0  }
   0xc   :  { %78 = vperm.xlu0 %550, %v44_v10   ;;  %68 = vperm.xlu1 %551, %v42_v11   ;;  %v41_v14 = vld [vmem:[%s718_s2 + $0x18] sm:$0xff]  ;;  %v40_v15 = vld [vmem:[%s718_s2 + $0x10] sm:$0xff]  ;;  %v39_v17 = vld [vmem:[%s718_s2 + $0x8] sm:$0xff]  ;;  %vm578_vm3 = vmmov 0   ;;  %vm369_vm4 = vcmask 261120   ;;  %s579_s24 = smov [#allocation3]  }
   0xd   :  { %v37_v16 = vld [vmem:[%s717_s1 + $0x38] sm:$0xff]  ;;  %v38_v18 = vld [vmem:[%s718_s2] sm:$0xff]  ;;  %v234_v20 = vld [vmem:[%s720_s4 + $0x10] sm:$0xff]  ;;  %535 = vmatprep.subr.mxu0 %v577_v60  ;;  %s451_s25 = sshll.u32 %s579_s24, 4  ;;  %s452_s25 = int_to_ptr.vmem [resolvable:$true] %s451_s25 }
   0xe   :  { %508 = vmatmul.mubr.msk.f32.gmra.mxu0 %vm86_vm1, %v35_v12  ;;  %v235_v19 = vld [vmem:[%s720_s4 + $0x18] sm:$0xff]  ;;  %v233_v21 = vld [vmem:[%s720_s4 + $0x8] sm:$0xff]  ;;  %v232_v22 = vld [vmem:[%s720_s4] sm:$0xff]  ;;  %s554_s26 = scalar_lea.vmem %s452_s25, 16  ;;  %p559_p1 = scmp.lt.s32.totalorder %s452_s25, %s452_s25 }
   0xf   :  { %510 = vmatprep.mubr.msk.f32.mxu0 %vm86_vm1, %v36_v13  ;;  %v359_v23 = vld [vmem:[#allocation2] sm:$0x1]  ;;  %v229_v57 = vld [vmem:[%s719_s3 + $0x8] sm:$0xff]  ;;  %v230_v58 = vld [vmem:[%s719_s3 + $0x10] sm:$0xff]  ;;  %p555_p0 = scmp.ne.s32.totalorder %s452_s25, %s554_s26 }
  0x10   :  { %63 = vperm.xlu0 %550, %v41_v14   ;;  %58 = vperm.xlu1 %551, %v40_v15   ;;  %v228_v24 = vld [vmem:[%s719_s3] sm:$0xff]  ;;  %v231_v59 = vld [vmem:[%s719_s3 + $0x18] sm:$0xff]  ;;  %v365_v14 = vlaneseq }
  0x11   :  { %529 = vmatprep.mubr.msk.f32.mxu1 %vm256_vm2, %v228_v24  ;;  %v358_v13 = vld [vmem:[%s721_s5] sm:$0x1]  ;;  %s558_s5 = scalar_lea.vmem %s452_s25, 32 }
  0x12   :  { %511 = vmatmul.mubr.msk.f32.gmra.mxu0 %vm86_vm1, %v37_v16  ;;  %v366_v15 = vshrl.u32 %v365_v14, 7  ;;  %p560_p2 = scmp.lt.s32.totalorder %s558_s5, %s554_s26 }
  0x13   :  { %543 = vmatprep.mubr.msk.f32.mxu0 %vm578_vm3, %v577_v60 }
  0x14   :  { %53 = vperm.xlu0 %550, %v39_v17   ;;  %48 = vperm.xlu1 %551, %v38_v18   ;;  %v367_v16 = vsub.s32 0, %v366_v15  ;;  %p561_p3 = por %p560_p2, %p559_p1 }
  0x16   :  { %p562_p4 = pnand %p561_p3, %p555_p0 }
  0x18   :  { %253 = vperm.xlu0 %550, %v235_v19   ;;  %248 = vperm.xlu1 %551, %v234_v20  }
  0x1c   :  { %243 = vperm.xlu0 %550, %v233_v21   ;;  %238 = vperm.xlu1 %551, %v232_v22  }
  0x20   :  { %362 = vperm.xlu0 %550, %v359_v23  }
  0x83   :  { %v84_v27 = vpop.permute.xlu0 %83  ;;  %v74_v28 = vpop.permute.xlu1 %73 }
  0x87   :  { %v79_v32 = vpop.permute.xlu0 %78  ;;  %v69_v33 = vpop.permute.xlu1 %68 }
  0x8b   :  { %v64_v41 = vpop.permute.xlu0 %63  ;;  %v59_v42 = vpop.permute.xlu1 %58 }
  0x8f   :  { %v54_v49 = vpop.permute.xlu0 %53  ;;  %v49_v50 = vpop.permute.xlu1 %48 }
  0x93   :  { %v254_v61 = vpop.permute.xlu0 %253  ;;  %v249_v63 = vpop.permute.xlu1 %248 }
  0x97   :  { %v244_v3 = vpop.permute.xlu0 %243  ;;  %v239_v8 = vpop.permute.xlu1 %238 }
  0x9b   :  { %v363_v17 = vpop.permute.xlu0 %362 }
  0x9c   :  { %v368_v18 = vrot.slane %v363_v17, %v367_v16 }
  0xc6   :  { %v503_v25 = vpop.f32.mrf.mxu0 }
  0xc7   :  { %v187_v51 = vadd.f32 %v503_v25, %v54_v49 }
  0xc8   :  { %v181_v26 = vpop.f32.mrf.mxu0 }
  0xc9   :  { %v182_v53 = vadd.f32 %v181_v26, %v49_v50  ;;  %v221_v55 = vmax.f32 %v187_v51, 0.0 }
  0xca   :  { %v506_v29 = vpop.f32.mrf.mxu0 }
  0xcb   :  { %v197_v45 = vadd.f32 %v506_v29, %v64_v41  ;;  %v220_v56 = vmax.f32 %v182_v53, 0.0 }
  0xcc   :  { %v191_v30 = vpop.f32.mrf.mxu0 }
  0xcd   :  { %v192_v47 = vadd.f32 %v191_v30, %v59_v42  ;;  %v223_v52 = vmax.f32 %v197_v45, 0.0 }
  0xce   :  { %v509_v31 = vpop.f32.mrf.mxu0 }
  0xcf   :  { %v207_v38 = vadd.f32 %v509_v31, %v74_v28  ;;  %v222_v54 = vmax.f32 %v192_v47, 0.0 }
  0xd0   :  { %v201_v34 = vpop.f32.mrf.mxu0 }
  0xd1   :  { %v202_v43 = vadd.f32 %v201_v34, %v69_v33  ;;  %v225_v46 = vmax.f32 %v207_v38, 0.0 }
  0xd2   :  { %v512_v35 = vpop.f32.mrf.mxu0 }
  0xd3   :  { %v217_v36 = vadd.f32 %v512_v35, %v84_v27  ;;  %v224_v48 = vmax.f32 %v202_v43, 0.0 }
  0xd4   :  { %v211_v37 = vpop.f32.mrf.mxu0 }
  0xd5   :  { %v227_v39 = vmax.f32 %v217_v36, 0.0  ;;  %v212_v40 = vadd.f32 %v211_v37, %v79_v32 }
  0xd7   :  { %v226_v44 = vmax.f32 %v212_v40, 0.0  ;;  %513 = vmatprep.subr.mxu1 %v227_v39 }
  0xd8   :  { %514 = vmatpush3.msra.mxu1 %v227_v39 }
  0xd9   :  { %515 = vmatprep.subr.mxu1 %v226_v44 }
  0xda   :  { %516 = vmatpush3.msra.mxu1 %v226_v44 }
  0xdb   :  { %517 = vmatprep.subr.mxu1 %v225_v46 }
  0xdc   :  { %518 = vmatpush3.msra.mxu1 %v225_v46 }
  0xdd   :  { %519 = vmatprep.subr.mxu1 %v224_v48 }
  0xde   :  { %520 = vmatpush3.msra.mxu1 %v224_v48 }
  0xdf   :  { %521 = vmatprep.subr.mxu1 %v223_v52 }
  0xe0   :  { %522 = vmatpush3.msra.mxu1 %v223_v52 }
  0xe1   :  { %523 = vmatprep.subr.mxu1 %v222_v54 }
  0xe2   :  { %524 = vmatpush3.msra.mxu1 %v222_v54 }
  0xe3   :  { %525 = vmatprep.subr.mxu1 %v221_v55 }
  0xe4   :  { %526 = vmatpush3.msra.mxu1 %v221_v55 }
  0xe5   :  { %527 = vmatprep.subr.mxu1 %v220_v56 }
  0xe6   :  { %528 = vmatpush3.msra.mxu1 %v220_v56 }
  0xe7   :  { %530 = vmatmul.mubr.msk.f32.vlgmr.msra.gmra.mxu1 %vm256_vm2, %v229_v57 }
  0xe8   :  { %532 = vmatprep.mubr.msk.f32.mxu1 %vm256_vm2, %v230_v58 }
  0xeb   :  { %533 = vmatmul.mubr.msk.f32.gmra.mxu1 %vm256_vm2, %v231_v59 }
 0x1a7   :  { %v531_v62 = vpop.f32.mrf.mxu1 }
 0x1a8   :  { %v341_v5 = vadd.f32 %v531_v62, %v244_v3 }
 0x1a9   :  { %v335_v0 = vpop.f32.mrf.mxu1 }
 0x1aa   :  { %v336_v9 = vadd.f32 %v335_v0, %v239_v8  ;;  %v355_v11 = vmax.f32 %v341_v5, 0.0 }
 0x1ab   :  { %v534_v1 = vpop.f32.mrf.mxu1 }
 0x1ac   :  { %v351_v2 = vadd.f32 %v534_v1, %v254_v61  ;;  %v354_v12 = vmax.f32 %v336_v9, 0.0 }
 0x1ad   :  { %v345_v4 = vpop.f32.mrf.mxu1 }
 0x1ae   :  { %v357_v6 = vmax.f32 %v351_v2, 0.0  ;;  %v346_v7 = vadd.f32 %v345_v4, %v249_v63 }
 0x1b0   :  { %v356_v10 = vmax.f32 %v346_v7, 0.0  ;;  %536 = vmatpush3.msra.mxu0 %v357_v6 }
 0x1b1   :  { %537 = vmatprep.subr.mxu0 %v577_v60 }
 0x1b2   :  { %538 = vmatpush3.msra.mxu0 %v356_v10 }
 0x1b3   :  { %539 = vmatprep.subr.mxu0 %v577_v60 }
 0x1b4   :  { %540 = vmatpush3.msra.mxu0 %v355_v11 }
 0x1b5   :  { %541 = vmatprep.subr.mxu0 %v577_v60 }
 0x1b6   :  { %542 = vmatpush3.msra.mxu0 %v354_v12 }
 0x1b7   :  { %544 = vmatmul.mubr.msk.f32.vlgmr.msra.gmra.mxu0 %vm369_vm4, %v358_v13 }
 0x277   :  { %v439_v19 = vpop.f32.mrf.mxu0 }
 0x278   :  { %v440_v20 = vadd.f32 %v439_v19, %v368_v18 }
 0x279   :  { %v545_v21 = vpop.f32.mrf.mxu0 }
 0x27a   :  { %552 = vtanh.f32 %v440_v20 }
 0x287   :  { %v553_v22 = vpop.eup %552 }
 0x288   :  { %444 = vst [vmem:[#allocation3] sm:$0x1] %v553_v22 }
 0x289   :  { %565 = shalt.err (!%p562_p4)
}
 0x28a   :  { %454 = dma.vmem_to_hbm [thread:$0]  %s452_s25, 16, %s723_s7, [#allocation4]  }
 0x28b   :  { %574 = dma.done.wait [#allocation4], 16  }
 0x28c   :  { %575 = vsyncadd [#allocation4], 4294967280 }
 0x28d   :  { %458 = vsyncpa [#allocation4], 1 }

</bundles_post_ra>
